<compile_context>
chip_gen: v6e
topology: v6e:2x2x1
jax: 0.10.0
libtpu: 0.0.40
codegen_flags: <defaults>
</compile_context>

<pallas_src>
import functools

import jax
import jax.numpy as jnp
from jax.experimental import pallas as pl
from jax.experimental.pallas import tpu as pltpu


def _round_up(x: int, m: int) -> int:
    return (x + m - 1) // m * m


def _mlp_kernel(x_ref, *refs, num_layers: int, sigmoid_output: bool):
    """Fused MLP: chain of Linear(+ReLU)(+sigmoid); all operands in VMEM.

    refs = (w0, b0, w1, b1, ..., w_{L-1}, b_{L-1}, o_ref)
      x_ref : (tile_n, in_pad)        f32
      w_i   : (in_pad_i, out_pad_i)   bf16 (default) or f32, pre-transposed,
                                      zero-padded at init
      b_i   : (1, out_pad_i)          f32, zero-padded
      o_ref : (tile_n, out_pad)
    """
    o_ref = refs[-1]
    params = refs[:-1]

    h = x_ref[...].astype(jnp.float32)
    for i in range(num_layers):
        w = params[2 * i][...]
        b = params[2 * i + 1][...].astype(jnp.float32)
        # bf16 MXU inputs with f32 accumulation (weights pre-cast at init);
        # the cast is a no-op on the pure-f32 validation path.
        y = jnp.dot(h.astype(w.dtype), w, preferred_element_type=jnp.float32) + b
        if i < num_layers - 1:
            y = jnp.maximum(y, 0.0)      # ReLU kept in f32 (v5e VPU has no bf16)
        h = y
    if sigmoid_output:
        h = jax.nn.sigmoid(h)            # EUP transcendental, f32
    o_ref[...] = h.astype(o_ref.dtype)


def _mlp_forward(x, flat_params, *, num_layers, sigmoid_output,
                 in_dim, out_dim, out_dtype):
    """(Maybe) pad -> single fused pallas_call over a token grid -> un-pad."""
    orig_shape = x.shape
    x2d = x.reshape(-1, orig_shape[-1])
    n = x2d.shape[0]

    in_pad = flat_params[0].shape[0]       # padded input feature dim
    out_pad = flat_params[-2].shape[1]     # padded output feature dim
    out_dtype = x.dtype if out_dtype is None else out_dtype

    # Token tiling: single sublane-aligned tile for small n; otherwise at
    # least 2 tiles (v7x dual-TC) capped at 512 rows per tile.
    if n <= 256:
        tile_n = _round_up(max(n, 8), 8)
    else:
        tile_n = min(512, _round_up(pl.cdiv(n, 2), 8))
    n_pad = _round_up(n, tile_n)

    # Pad x only when actually needed (SAM's in_dim=256 + aligned n skips the
    # extra HBM read/write entirely).
    row_pad, col_pad = n_pad - n, in_pad - in_dim
    if row_pad or col_pad:
        x_p = jnp.pad(x2d, ((0, row_pad), (0, col_pad)))
    else:
        x_p = x2d

    grid = (n_pad // tile_n,)
    in_specs = [pl.BlockSpec((tile_n, in_pad), lambda i: (i, 0))]
    for p in flat_params:
        # Constant index_map -> weights/biases stay VMEM-resident across tiles.
        in_specs.append(pl.BlockSpec(p.shape, lambda i: (0, 0)))
    out_specs = pl.BlockSpec((tile_n, out_pad), lambda i: (i, 0))

    # VMEM budget: 2x weight buffers + double-buffered x/out tiles + per-layer
    # f32 activations, with headroom.  Keeps large tiles compiling on v5e
    # (16 MiB default scoped) without exceeding v7x physical (64 MiB).
    param_bytes = sum(p.size * p.dtype.itemsize for p in flat_params)
    io_bytes = 2 * tile_n * (in_pad * x_p.dtype.itemsize
                             + out_pad * jnp.dtype(out_dtype).itemsize)
    act_bytes = sum(tile_n * p.shape[1] * 4 for p in flat_params[0::2])
    vmem_limit = int(1.5 * (2 * param_bytes + io_bytes + 2 * act_bytes)) + (4 << 20)
    vmem_limit = max(32 << 20, min(64 << 20, vmem_limit))

    kernel = functools.partial(
        _mlp_kernel, num_layers=num_layers, sigmoid_output=sigmoid_output)

    y = pl.pallas_call(
        kernel,
        out_shape=jax.ShapeDtypeStruct((n_pad, out_pad), out_dtype),
        grid=grid,
        in_specs=in_specs,
        out_specs=out_specs,
        compiler_params=pltpu.CompilerParams(
            dimension_semantics=("parallel",),
            vmem_limit_bytes=vmem_limit),
    )(x_p, *flat_params)

    if n_pad != n or out_pad != out_dim:
        y = y[:n, :out_dim]
    return y.reshape(orig_shape[:-1] + (out_dim,))


class MLPPallas:
    """JAX/Pallas port of SAM's MLP module (mask_decoder.MLP)."""

    def __init__(self, input_dim, hidden_dim, output_dim, num_layers,
                 sigmoid_output=False, *, key=None, dtype=jnp.float32,
                 mxu_dtype=jnp.bfloat16, out_dtype=None):
        self.num_layers = num_layers
        self.sigmoid_output = sigmoid_output
        self.input_dim = input_dim
        self.output_dim = output_dim

        h = [hidden_dim] * (num_layers - 1)
        dims_in = [input_dim] + h
        dims_out = h + [output_dim]

        if key is None:
            key = jax.random.PRNGKey(0)

        w_store_dtype = dtype if mxu_dtype is None else mxu_dtype

        self.raw_params = []   # (W (out,in), b (out,)) — PyTorch layout, f32
        flat_padded = []       # W_T zero-padded + pre-cast, b (1, out_pad) f32
        for n_in, n_out in zip(dims_in, dims_out):
            key, kw, kb = jax.random.split(key, 3)
            # PyTorch nn.Linear default init: U(-1/sqrt(fan_in), 1/sqrt(fan_in))
            bound = 1.0 / (n_in ** 0.5)
            w = jax.random.uniform(kw, (n_out, n_in), dtype, -bound, bound)
            b = jax.random.uniform(kb, (n_out,), dtype, -bound, bound)
            self.raw_params.append((w, b))

            in_p = _round_up(n_in, 128)
            out_p = _round_up(n_out, 128)
            w_t_pad = jnp.zeros((in_p, out_p), w_store_dtype)
            w_t_pad = w_t_pad.at[:n_in, :n_out].set(w.T.astype(w_store_dtype))
            b_pad = jnp.zeros((1, out_p), jnp.float32)
            b_pad = b_pad.at[0, :n_out].set(b.astype(jnp.float32))
            flat_padded.extend([w_t_pad, b_pad])
        self.flat_params = tuple(flat_padded)

        self._forward = jax.jit(functools.partial(
            _mlp_forward,
            num_layers=num_layers,
            sigmoid_output=sigmoid_output,
            in_dim=input_dim,
            out_dim=output_dim,
            out_dtype=out_dtype))

    def __call__(self, x):
        return self._forward(x, self.flat_params)


def _reference(x, raw_params, sigmoid_output):
    h = x.reshape(-1, x.shape[-1])
    L = len(raw_params)
    for i, (w, b) in enumerate(raw_params):
        h = h @ w.T + b
        if i < L - 1:
            h = jnp.maximum(h, 0.0)
    if sigmoid_output:
        h = jax.nn.sigmoid(h)
    return h.reshape(x.shape[:-1] + (raw_params[-1][0].shape[0],))


if __name__ == "__main__":
    key = jax.random.PRNGKey(0)
    kx1, kx2, kp1, kp2 = jax.random.split(key, 4)

    # --- Test 1: small shapes, exact f32 MXU path (tight tolerance) ---------
    batch, tokens = 2, 8
    in_d, hid_d, out_d, L = 32, 64, 16, 3
    x1 = jax.random.normal(kx1, (batch, tokens, in_d), jnp.float32)
    mlp_f32 = MLPPallas(in_d, hid_d, out_d, L, sigmoid_output=False,
                        key=kp1, mxu_dtype=None)
    y1 = jax.block_until_ready(mlp_f32(x1))
    r1 = _reference(x1, mlp_f32.raw_params, False)
    assert y1.shape == r1.shape == (batch, tokens, out_d)
    assert jnp.allclose(y1, r1, atol=1e-5, rtol=1e-5)

    # --- Test 2: SAM-like dims, default bf16-MXU path, multi-tile grid ------
    batch2, tokens2 = 3, 100                 # n = 300 -> 2 token tiles
    in_d2, hid_d2, out_d2, L2 = 256, 256, 32, 3
    x2 = jax.random.normal(kx2, (batch2, tokens2, in_d2), jnp.float32)
    mlp_bf16 = MLPPallas(in_d2, hid_d2, out_d2, L2, sigmoid_output=True, key=kp2)
    y2 = jax.block_until_ready(mlp_bf16(x2))
    r2 = _reference(x2, mlp_bf16.raw_params, True)
    assert y2.shape == r2.shape == (batch2, tokens2, out_d2)
    # bf16 MXU inputs with f32 accumulation -> relaxed tolerance.
    assert jnp.allclose(y2, r2, atol=5e-2, rtol=5e-2)

    print("KERNEL_OK")
</pallas_src>

<mosaic_0001>
module attributes {stable_mosaic.version = 11 : i64} {
  func.func @_mlp_kernel(%arg0: i32, %arg1: memref<16x128xf32, #tpu.memory_space<vmem>>, %arg2: memref<128x128xf32, #tpu.memory_space<vmem>>, %arg3: memref<1x128xf32, #tpu.memory_space<vmem>>, %arg4: memref<128x128xf32, #tpu.memory_space<vmem>>, %arg5: memref<1x128xf32, #tpu.memory_space<vmem>>, %arg6: memref<128x128xf32, #tpu.memory_space<vmem>>, %arg7: memref<1x128xf32, #tpu.memory_space<vmem>>, %arg8: memref<16x128xf32, #tpu.memory_space<vmem>>) attributes {dimension_semantics = [#tpu.dimension_semantics<parallel>], iteration_bounds = array<i64: 1>, scalar_prefetch = 0 : i64, scratch_operands = 0 : i64, tpu.core_type = #tpu.core_type<tc>, window_params = [{transform_indices = @transform_0, window_bounds = array<i64: 16, 128>}, {pipeline_mode = #tpu.pipeline_mode<synchronous>, transform_indices = @transform_1, window_bounds = array<i64: 128, 128>}, {pipeline_mode = #tpu.pipeline_mode<synchronous>, transform_indices = @transform_2, window_bounds = array<i64: 1, 128>}, {pipeline_mode = #tpu.pipeline_mode<synchronous>, transform_indices = @transform_3, window_bounds = array<i64: 128, 128>}, {pipeline_mode = #tpu.pipeline_mode<synchronous>, transform_indices = @transform_4, window_bounds = array<i64: 1, 128>}, {pipeline_mode = #tpu.pipeline_mode<synchronous>, transform_indices = @transform_5, window_bounds = array<i64: 128, 128>}, {pipeline_mode = #tpu.pipeline_mode<synchronous>, transform_indices = @transform_6, window_bounds = array<i64: 1, 128>}, {transform_indices = @transform_7, window_bounds = array<i64: 16, 128>}]} {
    %c0 = arith.constant 0 : index
    %c0_0 = arith.constant 0 : index
    %0 = vector.load %arg1[%c0, %c0_0] : memref<16x128xf32, #tpu.memory_space<vmem>>, vector<16x128xf32>
    %c0_1 = arith.constant 0 : index
    %c0_2 = arith.constant 0 : index
    %1 = vector.load %arg2[%c0_1, %c0_2] : memref<128x128xf32, #tpu.memory_space<vmem>>, vector<128x128xf32>
    %c0_3 = arith.constant 0 : index
    %c0_4 = arith.constant 0 : index
    %2 = vector.load %arg3[%c0_3, %c0_4] : memref<1x128xf32, #tpu.memory_space<vmem>>, vector<1x128xf32>
    %cst = arith.constant dense<0.000000e+00> : vector<16x128xf32>
    %3 = tpu.matmul %0, %1, %cst {dimension_numbers = #tpu.dot_dimension_numbers<[1], [0], [0], [1], [0, 0, 1, 1], [], []>} : vector<16x128xf32>, vector<128x128xf32>, vector<16x128xf32> -> vector<16x128xf32>
    %4 = vector.broadcast %2 : vector<1x128xf32> to vector<16x128xf32>
    %5 = arith.addf %3, %4 : vector<16x128xf32>
    %cst_5 = arith.constant 0.000000e+00 : f32
    %6 = vector.broadcast %cst_5 : f32 to vector<16x128xf32>
    %7 = arith.maximumf %5, %6 : vector<16x128xf32>
    %c0_6 = arith.constant 0 : index
    %c0_7 = arith.constant 0 : index
    %8 = vector.load %arg4[%c0_6, %c0_7] : memref<128x128xf32, #tpu.memory_space<vmem>>, vector<128x128xf32>
    %c0_8 = arith.constant 0 : index
    %c0_9 = arith.constant 0 : index
    %9 = vector.load %arg5[%c0_8, %c0_9] : memref<1x128xf32, #tpu.memory_space<vmem>>, vector<1x128xf32>
    %cst_10 = arith.constant dense<0.000000e+00> : vector<16x128xf32>
    %10 = tpu.matmul %7, %8, %cst_10 {dimension_numbers = #tpu.dot_dimension_numbers<[1], [0], [0], [1], [0, 0, 1, 1], [], []>} : vector<16x128xf32>, vector<128x128xf32>, vector<16x128xf32> -> vector<16x128xf32>
    %11 = vector.broadcast %9 : vector<1x128xf32> to vector<16x128xf32>
    %12 = arith.addf %10, %11 : vector<16x128xf32>
    %cst_11 = arith.constant 0.000000e+00 : f32
    %13 = vector.broadcast %cst_11 : f32 to vector<16x128xf32>
    %14 = arith.maximumf %12, %13 : vector<16x128xf32>
    %c0_12 = arith.constant 0 : index
    %c0_13 = arith.constant 0 : index
    %15 = vector.load %arg6[%c0_12, %c0_13] : memref<128x128xf32, #tpu.memory_space<vmem>>, vector<128x128xf32>
    %c0_14 = arith.constant 0 : index
    %c0_15 = arith.constant 0 : index
    %16 = vector.load %arg7[%c0_14, %c0_15] : memref<1x128xf32, #tpu.memory_space<vmem>>, vector<1x128xf32>
    %cst_16 = arith.constant dense<0.000000e+00> : vector<16x128xf32>
    %17 = tpu.matmul %14, %15, %cst_16 {dimension_numbers = #tpu.dot_dimension_numbers<[1], [0], [0], [1], [0, 0, 1, 1], [], []>} : vector<16x128xf32>, vector<128x128xf32>, vector<16x128xf32> -> vector<16x128xf32>
    %18 = vector.broadcast %16 : vector<1x128xf32> to vector<16x128xf32>
    %19 = arith.addf %17, %18 : vector<16x128xf32>
    %c0_17 = arith.constant 0 : index
    %c0_18 = arith.constant 0 : index
    %20 = vector.load %arg8[%c0_17, %c0_18] : memref<16x128xf32, #tpu.memory_space<vmem>>, vector<16x128xf32>
    tpu.vector_store %arg8[%c0_17, %c0_18], %19 {strides = array<i32>} : memref<16x128xf32, #tpu.memory_space<vmem>>, vector<16x128xf32>,
    return
  }
  func.func @transform_0(%arg0: i32) -> (i32, i32) {
    %c0_i32 = arith.constant 0 : i32
    %c0_i32_0 = arith.constant 0 : i32
    return %arg0, %c0_i32 : i32, i32
  }
  func.func @transform_1(%arg0: i32) -> (i32, i32) {
    %c0_i32 = arith.constant 0 : i32
    %c0_i32_0 = arith.constant 0 : i32
    %c0_i32_1 = arith.constant 0 : i32
    return %c0_i32, %c0_i32_0 : i32, i32
  }
  func.func @transform_2(%arg0: i32) -> (i32, i32) {
    %c0_i32 = arith.constant 0 : i32
    %c0_i32_0 = arith.constant 0 : i32
    %c0_i32_1 = arith.constant 0 : i32
    return %c0_i32, %c0_i32_0 : i32, i32
  }
  func.func @transform_3(%arg0: i32) -> (i32, i32) {
    %c0_i32 = arith.constant 0 : i32
    %c0_i32_0 = arith.constant 0 : i32
    %c0_i32_1 = arith.constant 0 : i32
    return %c0_i32, %c0_i32_0 : i32, i32
  }
  func.func @transform_4(%arg0: i32) -> (i32, i32) {
    %c0_i32 = arith.constant 0 : i32
    %c0_i32_0 = arith.constant 0 : i32
    %c0_i32_1 = arith.constant 0 : i32
    return %c0_i32, %c0_i32_0 : i32, i32
  }
  func.func @transform_5(%arg0: i32) -> (i32, i32) {
    %c0_i32 = arith.constant 0 : i32
    %c0_i32_0 = arith.constant 0 : i32
    %c0_i32_1 = arith.constant 0 : i32
    return %c0_i32, %c0_i32_0 : i32, i32
  }
  func.func @transform_6(%arg0: i32) -> (i32, i32) {
    %c0_i32 = arith.constant 0 : i32
    %c0_i32_0 = arith.constant 0 : i32
    %c0_i32_1 = arith.constant 0 : i32
    return %c0_i32, %c0_i32_0 : i32, i32
  }
  func.func @transform_7(%arg0: i32) -> (i32, i32) {
    %c0_i32 = arith.constant 0 : i32
    %c0_i32_0 = arith.constant 0 : i32
    return %arg0, %c0_i32 : i32, i32
  }
}

</mosaic_0001>

<bundles_post_ra>
// kernel: _mlp_forward.1
= control target key start
LH: loop header
LB: loop body
LE: loop exit
PB: predicated region body
PF: predicated region fallthrough
CT: control target
= control target key end

     0   :  { %12 = vsyncpa [#allocation3], 0  ;;  %s681_s0 = inlined_call_operand.vmem [shape: f32[16,128], index: 0, kind: input, shape index: {}]   ;;  %s682_s1 = inlined_call_operand.hbm [shape: f32[128,128], index: 1, kind: input, shape index: {}]   ;;  %s683_s2 = inlined_call_operand.vmem [shape: f32[1,128], index: 2, kind: input, shape index: {}]   ;;  %s684_s3 = inlined_call_operand.hbm [shape: f32[128,128], index: 3, kind: input, shape index: {}]   ;;  %s685_s4 = inlined_call_operand.vmem [shape: f32[1,128], index: 4, kind: input, shape index: {}]   ;;  %s686_s5 = inlined_call_operand.hbm [shape: f32[128,128], index: 5, kind: input, shape index: {}]   ;;  %s687_s6 = inlined_call_operand.vmem [shape: f32[1,128], index: 6, kind: input, shape index: {}]   ;;  %s688_s7 = inlined_call_operand.vmem [shape: f32[16,128], index: 7, kind: output, shape index: {}]  }
   0x1   :  { %13 = vsyncpa [#allocation5], 0  ;;  %s606_s24 = smov [#allocation4]   ;;  %s607_s26 = smov [#allocation2]  }
   0x2   :  { %s35_s25 = sshll.u32 %s606_s24, 4  ;;  %s21_s27 = sshll.u32 %s607_s26, 4  ;;  %s36_s25 = int_to_ptr.vmem [resolvable:$true] %s35_s25  ;;  %s22_s27 = int_to_ptr.vmem [resolvable:$true] %s21_s27 }
   0x3   :  { %s550_s28 = scalar_lea.vmem %s36_s25, 2048  ;;  %p555_p1 = scmp.lt.s32.totalorder %s36_s25, %s36_s25 }
   0x4   :  { %p551_p0 = scmp.ne.s32.totalorder %s36_s25, %s550_s28  ;;  %p556_p2 = scmp.lt.s32.totalorder %s550_s28, %s550_s28 }
   0x6   :  { %p557_p3 = por %p556_p2, %p555_p1 }
   0x8   :  { %p558_p4 = pnand %p557_p3, %p551_p0 }
   0xa   :  { %561 = shalt.err (!%p558_p4)
}
   0xb   :  { %s608_s29 = smov 128   ;;  %s609_s30 = smov 8  }
   0xc   :  { %41 = dma.hbm_to_vmem [thread:$0]  %s684_s3, 2048, %s36_s25, [#allocation5], %s608_s29, %s608_s29, %s609_s30  }
   0xd   :  { %s570_s10 = scalar_lea.vmem %s22_s27, 2048  ;;  %p575_p6 = scmp.lt.s32.totalorder %s22_s27, %s22_s27 }
   0xe   :  { %p571_p5 = scmp.ne.s32.totalorder %s22_s27, %s570_s10  ;;  %p576_p7 = scmp.lt.s32.totalorder %s570_s10, %s570_s10 }
  0x10   :  { %p577_p8 = por %p576_p7, %p575_p6 }
  0x12   :  { %p578_p9 = pnand %p577_p8, %p571_p5 }
  0x14   :  { %581 = shalt.err (!%p578_p9)
}
  0x15   :  { %27 = dma.hbm_to_vmem [thread:$0]  %s682_s1, 2048, %s22_s27, [#allocation3], %s608_s29, %s608_s29, %s609_s30  }
  0x16   :  { %s610_s13 = smov [#allocation6]  }
  0x17   :  { %s49_s14 = sshll.u32 %s610_s13, 4  ;;  %s50_s14 = int_to_ptr.vmem [resolvable:$true] %s49_s14 }
  0x18   :  { %s590_s15 = scalar_lea.vmem %s50_s14, 2048  ;;  %p595_p11 = scmp.lt.s32.totalorder %s50_s14, %s50_s14 }
  0x19   :  { %p591_p10 = scmp.ne.s32.totalorder %s50_s14, %s590_s15  ;;  %p596_p12 = scmp.lt.s32.totalorder %s590_s15, %s590_s15 }
  0x1b   :  { %p597_p13 = por %p596_p12, %p595_p11 }
  0x1d   :  { %p598_p0 = pnand %p597_p13, %p591_p10 }
  0x1f   :  { %601 = shalt.err (!%p598_p0)
}
  0x20   :  { %55 = dma.hbm_to_vmem [thread:$0]  %s686_s5, 2048, %s50_s14, [#allocation5], %s608_s29, %s608_s29, %s609_s30  }
  0x21   :  { %602 = dma.done.wait [#allocation3], 2048  }
  0x22   :  { %603 = vsyncadd [#allocation3], 4294965248 }
  0x23   :  { %604 = dma.done.wait [#allocation5], 4096  }
  0x24   :  { %605 = vsyncadd [#allocation5], 4294963200  ;;  %v84_v0 = vld [vmem:[#allocation2 + $0x78] sm:$0xff]  ;;  %v83_v1 = vld [vmem:[#allocation2 + $0x70] sm:$0xff] }
  0x25   :  { %432 = vmatprep.subr.mxu0 %v84_v0  ;;  %v82_v2 = vld [vmem:[#allocation2 + $0x68] sm:$0xff]  ;;  %v81_v3 = vld [vmem:[#allocation2 + $0x60] sm:$0xff]  ;;  %v80_v5 = vld [vmem:[#allocation2 + $0x58] sm:$0xff] }
  0x26   :  { %433 = vmatpush3.msra.mxu0 %v84_v0  ;;  %v67_v4 = vld [vmem:[%s681_s0] sm:$0xff]  ;;  %v184_v6 = vld [vmem:[#allocation4 + $0x78] sm:$0xff]  ;;  %v183_v7 = vld [vmem:[#allocation4 + $0x70] sm:$0xff] }
  0x27   :  { %434 = vmatprep.subr.mxu0 %v83_v1  ;;  %464 = vmatprep.mubr.f32.mxu0 %v67_v4  ;;  %v79_v8 = vld [vmem:[#allocation2 + $0x50] sm:$0xff]  ;;  %v182_v9 = vld [vmem:[#allocation4 + $0x68] sm:$0xff]  ;;  %v181_v11 = vld [vmem:[#allocation4 + $0x60] sm:$0xff] }
  0x28   :  { %435 = vmatpush3.msra.mxu0 %v83_v1  ;;  %467 = vmatprep.subr.mxu1 %v184_v6  ;;  %v78_v10 = vld [vmem:[#allocation2 + $0x48] sm:$0xff]  ;;  %v77_v12 = vld [vmem:[#allocation2 + $0x40] sm:$0xff]  ;;  %v180_v13 = vld [vmem:[#allocation4 + $0x58] sm:$0xff] }
  0x29   :  { %436 = vmatprep.subr.mxu0 %v82_v2  ;;  %468 = vmatpush3.msra.mxu1 %v184_v6  ;;  %v76_v14 = vld [vmem:[#allocation2 + $0x38] sm:$0xff]  ;;  %v179_v15 = vld [vmem:[#allocation4 + $0x50] sm:$0xff]  ;;  %v178_v17 = vld [vmem:[#allocation4 + $0x48] sm:$0xff] }
  0x2a   :  { %437 = vmatpush3.msra.mxu0 %v82_v2  ;;  %469 = vmatprep.subr.mxu1 %v183_v7  ;;  %v75_v16 = vld [vmem:[#allocation2 + $0x30] sm:$0xff]  ;;  %v74_v18 = vld [vmem:[#allocation2 + $0x28] sm:$0xff]  ;;  %v177_v19 = vld [vmem:[#allocation4 + $0x40] sm:$0xff] }
  0x2b   :  { %438 = vmatprep.subr.mxu0 %v81_v3  ;;  %470 = vmatpush3.msra.mxu1 %v183_v7  ;;  %v73_v20 = vld [vmem:[#allocation2 + $0x20] sm:$0xff]  ;;  %v176_v21 = vld [vmem:[#allocation4 + $0x38] sm:$0xff]  ;;  %v175_v23 = vld [vmem:[#allocation4 + $0x30] sm:$0xff] }
  0x2c   :  { %439 = vmatpush3.msra.mxu0 %v81_v3  ;;  %471 = vmatprep.subr.mxu1 %v182_v9  ;;  %v72_v22 = vld [vmem:[#allocation2 + $0x18] sm:$0xff]  ;;  %v71_v24 = vld [vmem:[#allocation2 + $0x10] sm:$0xff]  ;;  %v174_v25 = vld [vmem:[#allocation4 + $0x28] sm:$0xff] }
  0x2d   :  { %440 = vmatprep.subr.mxu0 %v80_v5  ;;  %472 = vmatpush3.msra.mxu1 %v182_v9  ;;  %v70_v26 = vld [vmem:[#allocation2 + $0x8] sm:$0xff]  ;;  %v173_v27 = vld [vmem:[#allocation4 + $0x20] sm:$0xff]  ;;  %v172_v30 = vld [vmem:[#allocation4 + $0x18] sm:$0xff] }
  0x2e   :  { %441 = vmatpush3.msra.mxu0 %v80_v5  ;;  %473 = vmatprep.subr.mxu1 %v181_v11  ;;  %v69_v28 = vld [vmem:[#allocation2] sm:$0xff]  ;;  %v68_v29 = vld [vmem:[%s681_s0 + $0x8] sm:$0xff]  ;;  %v171_v31 = vld [vmem:[#allocation4 + $0x10] sm:$0xff] }
  0x2f   :  { %442 = vmatprep.subr.mxu0 %v79_v8  ;;  %474 = vmatpush3.msra.mxu1 %v181_v11  ;;  %v170_v32 = vld [vmem:[#allocation4 + $0x8] sm:$0xff]  ;;  %v169_v33 = vld [vmem:[#allocation4] sm:$0xff]  ;;  %v284_v34 = vld [vmem:[#allocation6 + $0x78] sm:$0xff] }
  0x30   :  { %443 = vmatpush3.msra.mxu0 %v79_v8  ;;  %475 = vmatprep.subr.mxu1 %v180_v13  ;;  %v283_v35 = vld [vmem:[#allocation6 + $0x70] sm:$0xff]  ;;  %v282_v36 = vld [vmem:[#allocation6 + $0x68] sm:$0xff]  ;;  %v281_v37 = vld [vmem:[#allocation6 + $0x60] sm:$0xff] }
  0x31   :  { %444 = vmatprep.subr.mxu0 %v78_v10  ;;  %476 = vmatpush3.msra.mxu1 %v180_v13  ;;  %v280_v38 = vld [vmem:[#allocation6 + $0x58] sm:$0xff]  ;;  %v279_v39 = vld [vmem:[#allocation6 + $0x50] sm:$0xff]  ;;  %v278_v40 = vld [vmem:[#allocation6 + $0x48] sm:$0xff] }
  0x32   :  { %445 = vmatpush3.msra.mxu0 %v78_v10  ;;  %477 = vmatprep.subr.mxu1 %v179_v15  ;;  %v277_v41 = vld [vmem:[#allocation6 + $0x40] sm:$0xff]  ;;  %v276_v42 = vld [vmem:[#allocation6 + $0x38] sm:$0xff]  ;;  %v275_v43 = vld [vmem:[#allocation6 + $0x30] sm:$0xff] }
  0x33   :  { %446 = vmatprep.subr.mxu0 %v77_v12  ;;  %478 = vmatpush3.msra.mxu1 %v179_v15  ;;  %v274_v44 = vld [vmem:[#allocation6 + $0x28] sm:$0xff]  ;;  %v273_v45 = vld [vmem:[#allocation6 + $0x20] sm:$0xff]  ;;  %v272_v53 = vld [vmem:[#allocation6 + $0x18] sm:$0xff] }
  0x34   :  { %447 = vmatpush3.msra.mxu0 %v77_v12  ;;  %479 = vmatprep.subr.mxu1 %v178_v17  ;;  %v375_v46 = vld [vmem:[%s683_s2] ss:$0 sm:$0xff]  ;;  %v271_v54 = vld [vmem:[#allocation6 + $0x10] sm:$0xff]  ;;  %v270_v55 = vld [vmem:[#allocation6 + $0x8] sm:$0xff] }
  0x35   :  { %448 = vmatprep.subr.mxu0 %v76_v14  ;;  %480 = vmatpush3.msra.mxu1 %v178_v17  ;;  %v269_v56 = vld [vmem:[#allocation6] sm:$0xff] }
  0x36   :  { %449 = vmatpush3.msra.mxu0 %v76_v14  ;;  %481 = vmatprep.subr.mxu1 %v177_v19  ;;  %v376_v57 = vld [vmem:[%s685_s4] ss:$0 sm:$0xff] }
  0x37   :  { %450 = vmatprep.subr.mxu0 %v75_v16  ;;  %482 = vmatpush3.msra.mxu1 %v177_v19  ;;  %v377_v0 = vld [vmem:[%s687_s6] ss:$0 sm:$0xff] }
  0x38   :  { %451 = vmatpush3.msra.mxu0 %v75_v16  ;;  %483 = vmatprep.subr.mxu1 %v176_v21 }
  0x39   :  { %452 = vmatprep.subr.mxu0 %v74_v18  ;;  %484 = vmatpush3.msra.mxu1 %v176_v21 }
  0x3a   :  { %453 = vmatpush3.msra.mxu0 %v74_v18  ;;  %485 = vmatprep.subr.mxu1 %v175_v23 }
  0x3b   :  { %454 = vmatprep.subr.mxu0 %v73_v20  ;;  %486 = vmatpush3.msra.mxu1 %v175_v23 }
  0x3c   :  { %455 = vmatpush3.msra.mxu0 %v73_v20  ;;  %487 = vmatprep.subr.mxu1 %v174_v25 }
  0x3d   :  { %456 = vmatprep.subr.mxu0 %v72_v22  ;;  %488 = vmatpush3.msra.mxu1 %v174_v25 }
  0x3e   :  { %457 = vmatpush3.msra.mxu0 %v72_v22  ;;  %489 = vmatprep.subr.mxu1 %v173_v27 }
  0x3f   :  { %458 = vmatprep.subr.mxu0 %v71_v24  ;;  %490 = vmatpush3.msra.mxu1 %v173_v27 }
  0x40   :  { %459 = vmatpush3.msra.mxu0 %v71_v24  ;;  %491 = vmatprep.subr.mxu1 %v172_v30 }
  0x41   :  { %460 = vmatprep.subr.mxu0 %v70_v26  ;;  %492 = vmatpush3.msra.mxu1 %v172_v30 }
  0x42   :  { %461 = vmatpush3.msra.mxu0 %v70_v26  ;;  %493 = vmatprep.subr.mxu1 %v171_v31 }
  0x43   :  { %462 = vmatprep.subr.mxu0 %v69_v28  ;;  %494 = vmatpush3.msra.mxu1 %v171_v31 }
  0x44   :  { %463 = vmatpush3.msra.mxu0 %v69_v28  ;;  %495 = vmatprep.subr.mxu1 %v170_v32 }
  0x45   :  { %465 = vmatmul.mubr.f32.vlgmr.msra.gmra.mxu0 %v68_v29  ;;  %496 = vmatpush3.msra.mxu1 %v170_v32 }
  0x46   :  { %497 = vmatprep.subr.mxu1 %v169_v33  ;;  %502 = vmatprep.subr.mxu0 %v284_v34 }
  0x47   :  { %498 = vmatpush3.msra.mxu1 %v169_v33  ;;  %503 = vmatpush3.msra.mxu0 %v284_v34 }
  0x48   :  { %504 = vmatprep.subr.mxu0 %v283_v35 }
  0x49   :  { %505 = vmatpush3.msra.mxu0 %v283_v35 }
  0x4a   :  { %506 = vmatprep.subr.mxu0 %v282_v36 }
  0x4b   :  { %507 = vmatpush3.msra.mxu0 %v282_v36 }
  0x4c   :  { %508 = vmatprep.subr.mxu0 %v281_v37 }
  0x4d   :  { %509 = vmatpush3.msra.mxu0 %v281_v37 }
  0x4e   :  { %510 = vmatprep.subr.mxu0 %v280_v38 }
  0x4f   :  { %511 = vmatpush3.msra.mxu0 %v280_v38 }
  0x50   :  { %512 = vmatprep.subr.mxu0 %v279_v39 }
  0x51   :  { %513 = vmatpush3.msra.mxu0 %v279_v39 }
  0x52   :  { %514 = vmatprep.subr.mxu0 %v278_v40 }
  0x53   :  { %515 = vmatpush3.msra.mxu0 %v278_v40 }
  0x54   :  { %516 = vmatprep.subr.mxu0 %v277_v41 }
  0x55   :  { %517 = vmatpush3.msra.mxu0 %v277_v41 }
  0x56   :  { %518 = vmatprep.subr.mxu0 %v276_v42 }
  0x57   :  { %519 = vmatpush3.msra.mxu0 %v276_v42 }
  0x58   :  { %520 = vmatprep.subr.mxu0 %v275_v43 }
  0x59   :  { %521 = vmatpush3.msra.mxu0 %v275_v43 }
  0x5a   :  { %522 = vmatprep.subr.mxu0 %v274_v44 }
  0x5b   :  { %523 = vmatpush3.msra.mxu0 %v274_v44 }
  0x5c   :  { %524 = vmatprep.subr.mxu0 %v273_v45 }
  0x5d   :  { %525 = vmatpush3.msra.mxu0 %v273_v45 }
  0x5e   :  { %526 = vmatprep.subr.mxu0 %v272_v53 }
  0x5f   :  { %527 = vmatpush3.msra.mxu0 %v272_v53 }
  0x60   :  { %528 = vmatprep.subr.mxu0 %v271_v54 }
  0x61   :  { %529 = vmatpush3.msra.mxu0 %v271_v54 }
  0x62   :  { %530 = vmatprep.subr.mxu0 %v270_v55 }
  0x63   :  { %531 = vmatpush3.msra.mxu0 %v270_v55 }
  0x64   :  { %532 = vmatprep.subr.mxu0 %v269_v56 }
  0x65   :  { %533 = vmatpush3.msra.mxu0 %v269_v56 }
 0x105   :  { %v466_v47 = vpop.f32.mrf.mxu0 }
 0x106   :  { %v164_v48 = vadd.f32 %v466_v47, %v375_v46 }
 0x107   :  { %v158_v49 = vpop.f32.mrf.mxu0 }
 0x108   :  { %v159_v50 = vadd.f32 %v375_v46, %v158_v49  ;;  %v168_v52 = vmax.f32 %v164_v48, 0.0 }
 0x10a   :  { %v167_v51 = vmax.f32 %v159_v50, 0.0 }
 0x10c   :  { %499 = vmatprep.mubr.f32.mxu1 %v167_v51 }
 0x10d   :  { %500 = vmatmul.mubr.f32.vlgmr.msra.gmra.mxu1 %v168_v52 }
 0x1cd   :  { %v501_v58 = vpop.f32.mrf.mxu1 }
 0x1ce   :  { %v264_v59 = vadd.f32 %v501_v58, %v376_v57 }
 0x1cf   :  { %v258_v60 = vpop.f32.mrf.mxu1 }
 0x1d0   :  { %v259_v61 = vadd.f32 %v376_v57, %v258_v60  ;;  %v268_v63 = vmax.f32 %v264_v59, 0.0 }
 0x1d2   :  { %v267_v62 = vmax.f32 %v259_v61, 0.0 }
 0x1d4   :  { %534 = vmatprep.mubr.f32.mxu0 %v267_v62 }
 0x1d5   :  { %535 = vmatmul.mubr.f32.vlgmr.msra.gmra.mxu0 %v268_v63 }
 0x295   :  { %v536_v1 = vpop.f32.mrf.mxu0 }
 0x296   :  { %v364_v2 = vadd.f32 %v536_v1, %v377_v0 }
 0x297   :  { %v358_v3 = vpop.f32.mrf.mxu0 }
 0x298   :  { %368 = vst [vmem:[%s688_s7 + $0x8] sm:$0xff] %v364_v2  ;;  %v359_v4 = vadd.f32 %v377_v0, %v358_v3 }
 0x29a   :  { %367 = vst [vmem:[%s688_s7] sm:$0xff] %v359_v4 }
 0x29b   :  { %373 = vsyncpa [#allocation3], 1 }
 0x29c   :  { %374 = vsyncpa [#allocation5], 1 }

</bundles_post_ra>
